<compile_context>
chip_gen: v5e
topology: v5e:2x2
jax: 0.10.0
libtpu: 0.0.40
codegen_flags: <defaults>
</compile_context>

<pallas_src>
import functools

import jax
import jax.numpy as jnp
import numpy as np
from jax.experimental import pallas as pl
from jax.experimental.pallas import tpu as pltpu


def _round_up(a, b):
    return (a + b - 1) // b * b


def _sigmoid(z):
    # Numerically stable (no inf intermediate); tanh runs on the EUP slot.
    return 0.5 * (jnp.tanh(0.5 * z) + 1.0)


def gate_3j_kernel(x_ref, w_ref, e_ref, e0_ref, y_ref, *, channel):
    # x_ref  : [TN, M*C]          lane-dense flattened input (lanes 0..C-1 == x[:, 0, :])
    # w_ref  : [C, (lmax+1)*C]    transposed nn.Linear weight (VMEM-resident, f32)
    # e_ref  : [(lmax+1)*C, M*C]  one-hot expansion: gate block l replicated over 2l+1 slots
    # e0_ref : [C, M*C]           one-hot placement into the l=0 slot (lanes 0..C-1)
    # y_ref  : [TN, M*C]          flattened output, single unmasked full-tile store
    C = channel
    x = x_ref[...].astype(jnp.float32)                  # [TN, M*C]
    x0 = x[:, :C]                                       # [TN, C] == x[:, 0, :]

    # after_line = Linear(x[:, 0, :])  (tiny MXU matmul, f32 accumulate)
    after = jnp.dot(x0, w_ref[...], preferred_element_type=jnp.float32)     # [TN, (lmax+1)*C]
    gate = _sigmoid(after)                                                  # [TN, (lmax+1)*C]

    # Lane-dense per-column multiplier via MXU expansion (no cross-lane concats).
    factor = jnp.dot(gate, e_ref[...], preferred_element_type=jnp.float32)  # [TN, M*C]

    # l = 0 slot should be SiLU(type0) = after0 * sigmoid(after0); x*factor gives
    # x0 * sigmoid(after0) there, so add ((after0 - x0) * gate0) scattered into lanes 0..C-1.
    fix = (after[:, :C] - x0) * gate[:, :C]                                 # [TN, C]
    fixup = jnp.dot(fix, e0_ref[...], preferred_element_type=jnp.float32)   # [TN, M*C]

    y_ref[...] = (x * factor + fixup).astype(y_ref.dtype)


def _vmem_capacity_bytes():
    try:
        info = pltpu.get_tpu_info()
        cap = getattr(info, "vmem_capacity_bytes", None)
        if cap:
            return int(cap)
    except Exception:
        pass
    return 64 << 20   # conservative (v7x per-TC)


def _expansion_matrices(lmax, channel):
    C = channel
    M = (lmax + 1) ** 2
    eye = np.eye(C, dtype=np.float32)
    e = np.zeros(((lmax + 1) * C, M * C), dtype=np.float32)
    col = 0
    for l in range(lmax + 1):
        for _ in range(2 * l + 1):
            e[l * C:(l + 1) * C, col:col + C] = eye
            col += C
    e0 = np.zeros((C, M * C), dtype=np.float32)
    e0[:, :C] = eye
    return jnp.asarray(e), jnp.asarray(e0)


def gate_3j(x, weight, *, lmax, channel, tile_n=2048, out_dtype=None):
    """x: [N, (lmax+1)^2, channel]; weight: [(lmax+1)*channel, channel] (PyTorch layout)."""
    N, M, C = x.shape
    assert M == (lmax + 1) ** 2 and C == channel
    MC = M * C
    out_dtype = x.dtype if out_dtype is None else out_dtype

    # Sublane multiple depends on dtype packing (f32: 8, bf16: 16, int8/fp8: 32).
    itemsize = jnp.dtype(x.dtype).itemsize
    sub = {4: 8, 2: 16, 1: 32}.get(itemsize, 8)

    # Tile over N. Cap so the grid has >= 2 steps when N allows (v7x's 2 TCs under
    # dimension_semantics=("parallel",)); ragged N handled by Pallas partial blocks.
    half_n = _round_up(pl.cdiv(N, 2), sub)
    tile_n = _round_up(max(1, min(tile_n, half_n)), sub)
    tile_n = max(tile_n, sub)
    grid_n = pl.cdiv(N, tile_n)

    # Free (layout-preserving) reshape; no pad / slice copies for ragged N.
    x_flat = x.reshape(N, MC)
    wt = weight.T.astype(jnp.float32)                    # [C, (lmax+1)*C]
    e, e0 = _expansion_matrices(lmax, channel)

    # VMEM: double-buffered x/y tiles + resident constants + slack (no extra fudge).
    const_bytes = (wt.size + e.size + e0.size) * 4
    vmem_bytes = (2 * tile_n * MC * (itemsize + jnp.dtype(out_dtype).itemsize)
                  + 2 * const_bytes + (2 << 20))
    cap = _vmem_capacity_bytes()
    vmem_bytes = int(min(max(vmem_bytes, 16 << 20), max(cap - (16 << 20), 32 << 20)))

    kernel = functools.partial(gate_3j_kernel, channel=channel)
    y_flat = pl.pallas_call(
        kernel,
        out_shape=jax.ShapeDtypeStruct((N, MC), out_dtype),
        grid=(grid_n,),
        in_specs=[
            pl.BlockSpec((tile_n, MC), lambda i: (i, 0)),              # x tile (lane-dense)
            pl.BlockSpec((C, (lmax + 1) * C), lambda i: (0, 0)),       # weight, resident
            pl.BlockSpec(((lmax + 1) * C, MC), lambda i: (0, 0)),      # expansion E, resident
            pl.BlockSpec((C, MC), lambda i: (0, 0)),                   # expansion E0, resident
        ],
        out_specs=pl.BlockSpec((tile_n, MC), lambda i: (i, 0)),
        compiler_params=pltpu.CompilerParams(
            dimension_semantics=("parallel",),   # megacore split on v7x
            vmem_limit_bytes=vmem_bytes),
    )(x_flat, wt, e, e0)

    return y_flat.reshape(N, M, C)


def gate_3j_ref(x, weight, *, lmax, channel):
    """Pure-JAX reference mirroring the PyTorch forward exactly."""
    after = x[:, 0, :] @ weight.T
    type0 = after[:, :channel]
    mult = _sigmoid(after[:, channel:])[:, None, :]
    y = jnp.zeros_like(x)
    y = y.at[:, 0, :].set(type0 * _sigmoid(type0))
    for i in range(1, lmax + 1):
        y = y.at[:, i * i:(i + 1) ** 2, :].set(
            x[:, i * i:(i + 1) ** 2, :]
            * mult[:, :, (i - 1) * channel:i * channel])
    return y


if __name__ == "__main__":
    lmax = 3
    channel = 32
    N = 80                      # deliberately not a multiple of the tile size
    M = (lmax + 1) ** 2         # 16

    key = jax.random.PRNGKey(0)
    kx, kw = jax.random.split(key)
    x = jax.random.normal(kx, (N, M, channel), dtype=jnp.float32)
    # Deterministic synthetic weight, nn.Linear(channel, channel*(lmax+1)) shape.
    weight = jax.random.normal(
        kw, ((lmax + 1) * channel, channel), dtype=jnp.float32) * 0.1

    # tile_n=32 so the demo exercises a multi-step grid (3 tiles) + ragged last block.
    y = gate_3j(x, weight, lmax=lmax, channel=channel, tile_n=32)
    y = jax.block_until_ready(y)

    y_ref = gate_3j_ref(x, weight, lmax=lmax, channel=channel)
    np.testing.assert_allclose(np.asarray(y), np.asarray(y_ref),
                               rtol=1e-5, atol=1e-5)
    print("KERNEL_OK")
</pallas_src>

<mosaic_0001>
module attributes {stable_mosaic.version = 11 : i64} {
  func.func @gate_3j_kernel(%arg0: i32, %arg1: memref<32x512xf32, #tpu.memory_space<vmem>>, %arg2: memref<32x128xf32, #tpu.memory_space<vmem>>, %arg3: memref<128x512xf32, #tpu.memory_space<vmem>>, %arg4: memref<32x512xf32, #tpu.memory_space<vmem>>, %arg5: memref<32x512xf32, #tpu.memory_space<vmem>>) attributes {dimension_semantics = [#tpu.dimension_semantics<parallel>], iteration_bounds = array<i64: 3>, scalar_prefetch = 0 : i64, scratch_operands = 0 : i64, tpu.core_type = #tpu.core_type<tc>, window_params = [{transform_indices = @transform_0, window_bounds = array<i64: 32, 512>}, {pipeline_mode = #tpu.pipeline_mode<synchronous>, transform_indices = @transform_1, window_bounds = array<i64: 32, 128>}, {pipeline_mode = #tpu.pipeline_mode<synchronous>, transform_indices = @transform_2, window_bounds = array<i64: 128, 512>}, {pipeline_mode = #tpu.pipeline_mode<synchronous>, transform_indices = @transform_3, window_bounds = array<i64: 32, 512>}, {transform_indices = @transform_4, window_bounds = array<i64: 32, 512>}]} {
    %c0 = arith.constant 0 : index
    %c0_0 = arith.constant 0 : index
    %0 = vector.load %arg1[%c0, %c0_0] : memref<32x512xf32, #tpu.memory_space<vmem>>, vector<32x512xf32>
    %1 = vector.extract_strided_slice %0 {offsets = [0, 0], sizes = [32, 32], strides = [1, 1]} : vector<32x512xf32> to vector<32x32xf32>
    %c0_1 = arith.constant 0 : index
    %c0_2 = arith.constant 0 : index
    %2 = vector.load %arg2[%c0_1, %c0_2] : memref<32x128xf32, #tpu.memory_space<vmem>>, vector<32x128xf32>
    %cst = arith.constant dense<0.000000e+00> : vector<32x128xf32>
    %3 = tpu.matmul %1, %2, %cst {dimension_numbers = #tpu.dot_dimension_numbers<[1], [0], [0], [1], [0, 0, 1, 1], [], []>} : vector<32x32xf32>, vector<32x128xf32>, vector<32x128xf32> -> vector<32x128xf32>
    %cst_3 = arith.constant 5.000000e-01 : f32
    %4 = vector.broadcast %cst_3 : f32 to vector<32x128xf32>
    %5 = arith.mulf %4, %3 : vector<32x128xf32>
    %6 = math.tanh %5 : vector<32x128xf32>
    %cst_4 = arith.constant 1.000000e+00 : f32
    %7 = vector.broadcast %cst_4 : f32 to vector<32x128xf32>
    %8 = arith.addf %6, %7 : vector<32x128xf32>
    %cst_5 = arith.constant 5.000000e-01 : f32
    %9 = vector.broadcast %cst_5 : f32 to vector<32x128xf32>
    %10 = arith.mulf %9, %8 : vector<32x128xf32>
    %c0_6 = arith.constant 0 : index
    %c0_7 = arith.constant 0 : index
    %11 = vector.load %arg3[%c0_6, %c0_7] : memref<128x512xf32, #tpu.memory_space<vmem>>, vector<128x512xf32>
    %cst_8 = arith.constant dense<0.000000e+00> : vector<32x512xf32>
    %12 = tpu.matmul %10, %11, %cst_8 {dimension_numbers = #tpu.dot_dimension_numbers<[1], [0], [0], [1], [0, 0, 1, 1], [], []>} : vector<32x128xf32>, vector<128x512xf32>, vector<32x512xf32> -> vector<32x512xf32>
    %13 = vector.extract_strided_slice %3 {offsets = [0, 0], sizes = [32, 32], strides = [1, 1]} : vector<32x128xf32> to vector<32x32xf32>
    %14 = arith.subf %13, %1 : vector<32x32xf32>
    %15 = vector.extract_strided_slice %10 {offsets = [0, 0], sizes = [32, 32], strides = [1, 1]} : vector<32x128xf32> to vector<32x32xf32>
    %16 = arith.mulf %14, %15 : vector<32x32xf32>
    %c0_9 = arith.constant 0 : index
    %c0_10 = arith.constant 0 : index
    %17 = vector.load %arg4[%c0_9, %c0_10] : memref<32x512xf32, #tpu.memory_space<vmem>>, vector<32x512xf32>
    %cst_11 = arith.constant dense<0.000000e+00> : vector<32x512xf32>
    %18 = tpu.matmul %16, %17, %cst_11 {dimension_numbers = #tpu.dot_dimension_numbers<[1], [0], [0], [1], [0, 0, 1, 1], [], []>} : vector<32x32xf32>, vector<32x512xf32>, vector<32x512xf32> -> vector<32x512xf32>
    %19 = arith.mulf %0, %12 : vector<32x512xf32>
    %20 = arith.addf %19, %18 : vector<32x512xf32>
    %c0_12 = arith.constant 0 : index
    %c0_13 = arith.constant 0 : index
    %21 = vector.load %arg5[%c0_12, %c0_13] : memref<32x512xf32, #tpu.memory_space<vmem>>, vector<32x512xf32>
    tpu.vector_store %arg5[%c0_12, %c0_13], %20 {strides = array<i32>} : memref<32x512xf32, #tpu.memory_space<vmem>>, vector<32x512xf32>,
    return
  }
  func.func @transform_0(%arg0: i32) -> (i32, i32) {
    %c0_i32 = arith.constant 0 : i32
    %c0_i32_0 = arith.constant 0 : i32
    return %arg0, %c0_i32 : i32, i32
  }
  func.func @transform_1(%arg0: i32) -> (i32, i32) {
    %c0_i32 = arith.constant 0 : i32
    %c0_i32_0 = arith.constant 0 : i32
    %c0_i32_1 = arith.constant 0 : i32
    return %c0_i32, %c0_i32_0 : i32, i32
  }
  func.func @transform_2(%arg0: i32) -> (i32, i32) {
    %c0_i32 = arith.constant 0 : i32
    %c0_i32_0 = arith.constant 0 : i32
    %c0_i32_1 = arith.constant 0 : i32
    return %c0_i32, %c0_i32_0 : i32, i32
  }
  func.func @transform_3(%arg0: i32) -> (i32, i32) {
    %c0_i32 = arith.constant 0 : i32
    %c0_i32_0 = arith.constant 0 : i32
    %c0_i32_1 = arith.constant 0 : i32
    return %c0_i32, %c0_i32_0 : i32, i32
  }
  func.func @transform_4(%arg0: i32) -> (i32, i32) {
    %c0_i32 = arith.constant 0 : i32
    %c0_i32_0 = arith.constant 0 : i32
    return %arg0, %c0_i32 : i32, i32
  }
}

</mosaic_0001>

<bundles_post_ra>
// kernel: tpu_custom_call.1
= control target key start
LH: loop header
LB: loop body
LE: loop exit
PB: predicated region body
PF: predicated region fallthrough
CT: control target
= control target key end

     0   :  { %s1578_s0 = inlined_call_operand.hbm [shape: f32[80,512], index: 0, kind: input, shape index: {}]   ;;  %s1579_s1 = inlined_call_operand.hbm [shape: f32[32,128], index: 1, kind: input, shape index: {}]   ;;  %s1580_s2 = inlined_call_operand.hbm [shape: f32[128,512], index: 2, kind: input, shape index: {}]   ;;  %s1581_s3 = inlined_call_operand.hbm [shape: f32[32,512], index: 3, kind: input, shape index: {}]   ;;  %s1582_s4 = inlined_call_operand.hbm [shape: f32[80,512], index: 4, kind: output, shape index: {}]  }
   0x1   :  { %1584 = sst [smem:[#allocation15_spill]] %s1579_s1 }
   0x2   :  { %9 = vsyncpa [#allocation3], 0 }
   0x3   :  { %11 = vsyncpa [#allocation3 + $0x1], 0 }
   0x4   :  { %12 = vsyncpa [#allocation6], 0 }
   0x5   :  { %13 = vsyncpa [#allocation9], 0 }
   0x6   :  { %14 = vsyncpa [#allocation4], 0 }
   0x7   :  { %16 = vsyncpa [#allocation4 + $0x1], 0  ;;  %s1272_s15 = smov 0   ;;  %s1274_s16 = smov 0  }
   0x8   :  { %s1276_s17 = smov 0   ;;  %s1278_s18 = smov 0  }
   0x9 LB: > { %s1293_s19 = sadd.s32 4294967295, %s1232_s18   ;;  %s874_s20 = sadd.s32 4294967294, %s1232_s18   ;;  %s1232_s18 = sphi %s1278_s18, %s1602_s18   ;;  %s1228_s17 = sphi %s1276_s17, %s1601_s17   ;;  %s1224_s16 = sphi %s1274_s16, %s1600_s16   ;;  %s1220_s15 = sphi %s1272_s15, %s1599_s15  }
   0xa   : > { %s1297_s21 = sadd.s32 1, %s1232_s18   ;;  %s29_s22 = sadd.s32 1, %s1228_s17 }
   0xb   : > { %s26_s23 = ssub.s32 %s1232_s18, %s1297_s21  ;;  %p36_p0 = scmp.ne.s32.totalorder %s1228_s17, %s1224_s16 }
   0xc   : > { %p27_p1 = scmp.eq.s32.totalorder %s26_s23, 0  ;;  %p37_p2 = scmp.eq.s32.totalorder %s1232_s18, 0 }
   0xd   : > { %p42_p3 = scmp.ne.s32.totalorder %s1224_s16, %s1220_s15  ;;  %p1583_p4 = scmp.eq.s32.totalorder %s1293_s19, 0 }
   0xe   : > { %s1309_s24 = scalar_select %p27_p1, %s1228_s17, %s29_s22  }
   0xf   : > { %p1311_p5 = por %p37_p2, %p36_p0  ;;  %p1317_p6 = por %p1583_p4, %p42_p3 }
  0x10   : > { %p129_p7 = scmp.eq.s32.totalorder %s1293_s19, 2  ;;  %p135_p8 = scmp.eq.s32.totalorder %s874_s20, 2 }
  0x11   : > { %p875_p9 = scmp.ge.s32.totalorder %s1232_s18, 1  ;;  %p142_p10 = scmp.lt.s32.totalorder %s1232_s18, 4 }
  0x12   : > { %p1324_p11 = por %p129_p7, %p36_p0  ;;  %p1328_p12 = por %p135_p8, %p42_p3 }
  0x13   : > { %p1332_p13 = pnand %p875_p9, %p142_p10  ;;  %s1590_s1 = sld [smem:[#allocation15_spill]] }
  0x14   : > { %s1588_s28 = scalar_select %p1328_p12, 1, 0 }
  0x15   : > { %p946_p1 = pneg %p1332_p13  ;;  %s1234_s7 = smov [#allocation5]  }
  0x16   : > { %s155_s8 = sshll.u32 %s1234_s7, 4  ;;  %s167_s12 = sshll.u32 %s1580_s2, 4  ;;  %s156_s8 = int_to_ptr.vmem [resolvable:$true] %s155_s8  ;;  %s168_s12 = int_to_ptr.hbm [resolvable:$true] %s167_s12 }
  0x17   : > { %p1343_p0 = pnand %p946_p1, %p1583_p4  ;;  %s1235_s13 = smov 128  }
  0x18   : > { %s1236_s14 = smov 8   ;;  %s1237_s20 = smov [#allocation7]  }
  0x19   : > { %s153_s6 = sshll.u32 %s1590_s1, 4  ;;  %s169_s22 = sshll.u32 %s1237_s20, 4  ;;  %s154_s6 = int_to_ptr.hbm [resolvable:$true] %s153_s6  ;;  %s170_s22 = int_to_ptr.vmem [resolvable:$true] %s169_s22 }
  0x1a   : > { %949 = dma.hbm_to_vmem [thread:$0]  (!%p1343_p0), %s154_s6, 512, %s156_s8, [#allocation6], %s1235_s13, %s1235_s13, %s1236_s14  }
  0x1b   : > { %s181_s5 = sshll.u32 %s1581_s3, 4  ;;  %s1238_s7 = smov 512   ;;  %s182_s5 = int_to_ptr.hbm [resolvable:$true] %s181_s5 }
  0x1c   : > { %s1239_s1 = smov 32   ;;  %s1240_s10 = smov [#allocation8]  }
  0x1d   : > { %952 = dma.hbm_to_vmem [thread:$0]  (!%p1343_p0), %s168_s12, 8192, %s170_s22, [#allocation6], %s1238_s7, %s1238_s7, %s1239_s1  }
  0x1e   : > { %s183_s11 = sshll.u32 %s1240_s10, 4  ;;  %p879_p2 = scmp.ge.s32.totalorder %s1232_s18, 3  ;;  %s184_s11 = int_to_ptr.vmem [resolvable:$true] %s183_s11 }
  0x1f   : > { %955 = dma.hbm_to_vmem [thread:$0]  (!%p1343_p0), %s182_s5, 2048, %s184_s11, [#allocation9], %s1238_s7, %s1238_s7, %s1239_s1  }
  0x20   : > { %193 = sbr.rel (%p879_p2) target bundleno = 73 (0x49), region = 28 }
  0x25   : > { %196 = sbr.rel (!%p1311_p5) target bundleno = 73 (0x49), region = 32  ;;  %s197_s6 = sand.u32 (%p1311_p5), 1, %s1228_s17  }
  0x26   : > { %s881_s8 = sshll.u32 (%p1311_p5), %s1232_s18, 2  ;;  %s880_s13 = sshll.u32 (%p1311_p5), %s197_s6, 7 }
  0x27   : > { %s203_s14 = ssub.s32 (%p1311_p5), 10, %s881_s8  ;;  %s1367_s1 = scalar_lea.sflag (%p1311_p5), [#allocation3], %s197_s6 }
  0x28   : > { %p204_p3 = scmp.lt.s32.totalorder (%p1311_p5), %s203_s14, 4  ;;  %s201_s22 = scalar_lea.vmem (%p1311_p5), [#allocation2], %s880_s13 }
  0x2a   : > { %s1604_s14 = smov (!%p204_p3, %s203_s14), 4 }
  0x2b   : > { %s926_s12 = sshll.u32 %s1604_s14, 5 }
  0x2c   : > { %s208_s20 = ssub.s32 128, %s926_s12 }
  0x2d   : > { %s209_s9 = sshll.u32 %s208_s20, 4 }
  0x2e   : > { %210 = vsyncadd %s1367_s1, %s209_s9  ;;  %p1370_p5 = scmp.ne.s32.totalorder %s926_s12, 0  ;;  %s928_s23 = sshll.u32 %s1232_s18, 7 }
  0x2f   : > { %s214_s7 = scalar_lea.hbm %s1578_s0, %s928_s23  ;;  %s1378_s10 = sshll.u32 %s201_s22, 4  ;;  %s219_s10 = int_to_ptr.vmem [resolvable:$true] %s1378_s10 }
  0x30   : > { %s216_s11 = sshll.u32 %s214_s7, 4  ;;  %s888_s6 = sshll.u32 %s1604_s14, 9  ;;  %s1381_s11 = int_to_ptr.hbm [resolvable:$true] %s216_s11 }
  0x31   : > { %s1108_s8 = sshra.s32 %s1381_s11, 4  ;;  %s1110_s13 = sshrl.u32 %s888_s6, 4  ;;  %s1109_s8 = int_to_ptr.hbm [resolvable:$true] %s1108_s8 }
  0x32   : > { %s1115_s12 = scalar_lea.hbm %s1109_s8, %s1110_s13  ;;  %s1119_s22 = scalar_lea.hbm %s1578_s0, 320 }
  0x33   : > { %p1116_p7 = scmp.ne.s32.totalorder %s1109_s8, %s1115_s12  ;;  %p1120_p10 = scmp.lt.s32.totalorder %s1109_s8, %s1578_s0 }
  0x34   : > { %p1121_p1 = scmp.lt.s32.totalorder %s1119_s22, %s1115_s12 }
  0x35   : > { %p1117_p8 = pnand %p1116_p7, %p1370_p5 }
  0x36   : > { %p1122_p0 = por %p1121_p1, %p1120_p10 }
  0x37   : > { %p1118_p9 = pneg %p1117_p8 }
  0x39   : > { %p1123_p2 = pnand %p1122_p0, %p1118_p9 }
  0x3b   : > { %1126 = shalt.err (!%p1123_p2)
}
  0x3c   : > { %s1127_s5 = sshra.s32 %s219_s10, 4  ;;  %s1241_s20 = smov [#allocation2]   ;;  %s1128_s5 = int_to_ptr.vmem [resolvable:$true] %s1127_s5 }
  0x3d   : > { %s1134_s7 = scalar_lea.vmem %s1128_s5, %s1110_s13  ;;  %s1138_s9 = scalar_lea.vmem %s1241_s20, 256 }
  0x3e   : > { %p1135_p3 = scmp.ne.s32.totalorder %s1128_s5, %s1134_s7  ;;  %p1140_p4 = scmp.lt.s32.totalorder %s1138_s9, %s1134_s7 }
  0x40   : > { %p1136_p7 = pnand %p1135_p3, %p1370_p5 }
  0x42   : > { %p1137_p8 = pneg %p1136_p7 }
  0x44   : > { %p1142_p12 = pnand %p1140_p4, %p1137_p8 }
  0x46   : > { %1145 = shalt.err (!%p1142_p12)
}
  0x47   : > { %s1242_s8 = smov 512   ;;  %s1243_s12 = smov 32  }
  0x48   : > { %224 = dma.hbm_to_vmem [thread:$0]  (%p1370_p5), %s1381_s11, %s888_s6, %s219_s10, %s1367_s1, %s1242_s8, %s1242_s8, %s1243_s12  }
  0x49 PF: > { %230 = sbr.rel (%p1332_p13) target bundleno = 455 (0x1c7), region = 36  ;;  %s1410_s13 = sand.u32 (!%p1332_p13), 1, %s1224_s16  }
  0x4a   : > { %s890_s22 = sshll.u32 (!%p1332_p13), %s1410_s13, 7  ;;  %s233_s23 = scalar_lea.sflag (!%p1332_p13), [#allocation3], %s1410_s13 }
  0x4b   : > { %s1416_s30 = scalar_lea.vmem (!%p1332_p13), [#allocation2], %s890_s22 }
  0x4e   : > { %1203 = dma.done.wait (%p1317_p6), %s233_s23, 2048  }
  0x4f   : > { %1205 = vsyncadd (%p1317_p6), %s233_s23, 4294965248  ;;  %p1593_p4 = scmp.eq.s32.totalorder %s1293_s19, 0 }
  0x51   : > { %1207 = dma.done.wait (%p1593_p4), [#allocation6], 8704   ;;  %p1594_p12 = pmov %p1593_p4 }
  0x52   : > { %p1595_p13 = pmov %p1593_p4 }
  0x53   : > { %1209 = vsyncadd (%p1594_p12), [#allocation6], 4294958592 }
  0x54   : > { %1211 = dma.done.wait (%p1595_p13), [#allocation9], 2048   ;;  %p1596_p5 = pmov %p1593_p4 }
  0x55   : > { %v308_v0 = vld [vmem:[#allocation5 + $0x18] sm:$0xff]  ;;  %v307_v1 = vld [vmem:[#allocation5 + $0x10] sm:$0xff]  ;;  %v306_v2 = vld [vmem:[#allocation5 + $0x8] sm:$0xff]  ;;  %vm309_vm0 = vcmask 261120   ;;  %s1484_s26 = scalar_lea.vmem [#allocation10], %s890_s22  ;;  %s748_s29 = scalar_lea.sflag [#allocation4], %s1410_s13 }
  0x56   : > { %1213 = vsyncadd (%p1596_p5), [#allocation9], 4294965248  ;;  %334 = vmatpush.msra.mxu0 %v308_v0  ;;  %v427_v3 = vld [vmem:[#allocation7 + $0x1e0] sm:$0xff]  ;;  %v428_v5 = vld [vmem:[#allocation7 + $0x1e8] sm:$0xff]  ;;  %s916_s14 = sshll.u32 (%p1324_p11), %s1293_s19, 2 }
  0x57   : > { %v305_v4 = vld [vmem:[#allocation5] sm:$0xff]  ;;  %431 = vmatpush.msra.mxu1 %v427_v3  ;;  %v429_v6 = vld [vmem:[#allocation7 + $0x1f0] sm:$0xff]  ;;  %460 = vmatpush.msra.mxu2 %v428_v5  ;;  %v424_v8 = vld [vmem:[#allocation7 + $0x1c8] sm:$0xff]  ;;  %s756_s1 = ssub.s32 (%p1324_p11), 10, %s916_s14 }
  0x58   : > { %335 = vmatpush.msra.mxu0 %v307_v1  ;;  %489 = vmatpush.msra.mxu3 %v429_v6  ;;  %v423_v7 = vld [vmem:[#allocation7 + $0x1c0] sm:$0xff]  ;;  %v425_v9 = vld [vmem:[#allocation7 + $0x1d0] sm:$0xff]  ;;  %v420_v12 = vld [vmem:[#allocation7 + $0x1a8] sm:$0xff]  ;;  %p757_p6 = scmp.lt.s32.totalorder (%p1324_p11), %s756_s1, 4 }
  0x59   : > { %v1431_v10 = vld [vmem:[%s1416_s30] sm:$0xff]  ;;  %432 = vmatpush.msra.mxu1 %v423_v7  ;;  %v430_v13 = vld [vmem:[#allocation7 + $0x1f8] sm:$0xff]  ;;  %461 = vmatpush.msra.mxu2 %v424_v8  ;;  %v421_v14 = vld [vmem:[#allocation7 + $0x1b0] sm:$0xff] }
  0x5a   : > { %336 = vmatpush.msra.mxu0 %v306_v2  ;;  %v419_v11 = vld [vmem:[#allocation7 + $0x1a0] sm:$0xff]  ;;  %490 = vmatpush.msra.mxu3 %v425_v9  ;;  %v416_v16 = vld [vmem:[#allocation7 + $0x188] sm:$0xff]  ;;  %v426_v17 = vld [vmem:[#allocation7 + $0x1d8] sm:$0xff] }
  0x5b   : > { %433 = vmatpush.msra.mxu1 %v419_v11  ;;  %v415_v15 = vld [vmem:[#allocation7 + $0x180] sm:$0xff]  ;;  %462 = vmatpush.msra.mxu2 %v420_v12  ;;  %v417_v18 = vld [vmem:[#allocation7 + $0x190] sm:$0xff]  ;;  %v412_v20 = vld [vmem:[#allocation7 + $0x168] sm:$0xff] }
  0x5c   : > { %337 = vmatpush.msra.mxu0 %v305_v4  ;;  %491 = vmatpush.msra.mxu3 %v421_v14  ;;  %v411_v19 = vld [vmem:[#allocation7 + $0x160] sm:$0xff]  ;;  %v422_v21 = vld [vmem:[#allocation7 + $0x1b8] sm:$0xff]  ;;  %v413_v22 = vld [vmem:[#allocation7 + $0x170] sm:$0xff] }
  0x5d   : > { %895 = vmatmul.msk.f32.vlgmr.msra.gmra.mxu0 %vm309_vm0, %v1431_v10  ;;  %434 = vmatpush.msra.mxu1 %v415_v15  ;;  %v407_v23 = vld [vmem:[#allocation7 + $0x140] sm:$0xff]  ;;  %v408_v24 = vld [vmem:[#allocation7 + $0x148] sm:$0xff]  ;;  %v418_v25 = vld [vmem:[#allocation7 + $0x198] sm:$0xff] }
  0x5e   : > { %518 = vmatpush.msrb.mxu0 %v430_v13  ;;  %463 = vmatpush.msra.mxu2 %v416_v16  ;;  %v409_v26 = vld [vmem:[#allocation7 + $0x150] sm:$0xff]  ;;  %v1436_v27 = vld [vmem:[%s1416_s30 + $0x20] sm:$0xff]  ;;  %v414_v29 = vld [vmem:[#allocation7 + $0x178] sm:$0xff] }
  0x5f   : > { %492 = vmatpush.msra.mxu3 %v417_v18  ;;  %435 = vmatpush.msra.mxu1 %v411_v19  ;;  %v403_v28 = vld [vmem:[#allocation7 + $0x120] sm:$0xff]  ;;  %v404_v30 = vld [vmem:[#allocation7 + $0x128] sm:$0xff]  ;;  %v405_v31 = vld [vmem:[#allocation7 + $0x130] sm:$0xff] }
  0x60   : > { %519 = vmatpush.msrb.mxu0 %v426_v17  ;;  %464 = vmatpush.msra.mxu2 %v412_v20  ;;  %v399_v32 = vld [vmem:[#allocation7 + $0x100] sm:$0xff]  ;;  %v410_v33 = vld [vmem:[#allocation7 + $0x158] sm:$0xff]  ;;  %v400_v34 = vld [vmem:[#allocation7 + $0x108] sm:$0xff] }
  0x61   : > { %493 = vmatpush.msra.mxu3 %v413_v22  ;;  %436 = vmatpush.msra.mxu1 %v407_v23  ;;  %v401_v35 = vld [vmem:[#allocation7 + $0x110] sm:$0xff]  ;;  %v395_v36 = vld [vmem:[#allocation7 + $0xe0] sm:$0xff]  ;;  %v406_v37 = vld [vmem:[#allocation7 + $0x138] sm:$0xff] }
  0x62   : > { %520 = vmatpush.msrb.mxu0 %v422_v21  ;;  %465 = vmatpush.msra.mxu2 %v408_v24  ;;  %v396_v38 = vld [vmem:[#allocation7 + $0xe8] sm:$0xff]  ;;  %v397_v39 = vld [vmem:[#allocation7 + $0xf0] sm:$0xff]  ;;  %v402_v40 = vld [vmem:[#allocation7 + $0x118] sm:$0xff] }
  0x63   : > { %494 = vmatpush.msra.mxu3 %v409_v26  ;;  %437 = vmatpush.msra.mxu1 %v403_v28  ;;  %v1441_v41 = vld [vmem:[%s1416_s30 + $0x40] sm:$0xff]  ;;  %v398_v42 = vld [vmem:[#allocation7 + $0xf8] sm:$0xff]  ;;  %v392_v45 = vld [vmem:[#allocation7 + $0xc8] sm:$0xff] }
  0x64   : > { %521 = vmatpush.msrb.mxu0 %v418_v25  ;;  %466 = vmatpush.msra.mxu2 %v404_v30  ;;  %v1446_v43 = vld [vmem:[%s1416_s30 + $0x60] sm:$0xff]  ;;  %v393_v46 = vld [vmem:[#allocation7 + $0xd0] sm:$0xff]  ;;  %v394_v47 = vld [vmem:[#allocation7 + $0xd8] sm:$0xff] }
  0x65   : > { %896 = vmatmul.msk.f32.gmra.mxu0 %vm309_vm0, %v1436_v27  ;;  %495 = vmatpush.msra.mxu3 %v405_v31  ;;  %v391_v44 = vld [vmem:[#allocation7 + $0xc0] sm:$0xff]  ;;  %v388_v49 = vld [vmem:[#allocation7 + $0xa8] sm:$0xff]  ;;  %v389_v50 = vld [vmem:[#allocation7 + $0xb0] sm:$0xff] }
  0x66   : > { %522 = vmatpush.msrb.mxu0 %v414_v29  ;;  %438 = vmatpush.msra.mxu1 %v399_v32  ;;  %v387_v48 = vld [vmem:[#allocation7 + $0xa0] sm:$0xff]  ;;  %v390_v51 = vld [vmem:[#allocation7 + $0xb8] sm:$0xff]  ;;  %v384_v53 = vld [vmem:[#allocation7 + $0x88] sm:$0xff] }
  0x67   : > { %467 = vmatpush.msra.mxu2 %v400_v34  ;;  %496 = vmatpush.msra.mxu3 %v401_v35  ;;  %v383_v52 = vld [vmem:[#allocation7 + $0x80] sm:$0xff]  ;;  %v385_v54 = vld [vmem:[#allocation7 + $0x90] sm:$0xff]  ;;  %v386_v55 = vld [vmem:[#allocation7 + $0x98] sm:$0xff] }
  0x68   : > { %523 = vmatpush.msrb.mxu0 %v410_v33  ;;  %439 = vmatpush.msra.mxu1 %v395_v36  ;;  %v379_v56 = vld [vmem:[#allocation7 + $0x60] sm:$0xff]  ;;  %v380_v57 = vld [vmem:[#allocation7 + $0x68] sm:$0xff]  ;;  %v381_v58 = vld [vmem:[#allocation7 + $0x70] sm:$0xff] }
  0x69   : > { %468 = vmatpush.msra.mxu2 %v396_v38  ;;  %497 = vmatpush.msra.mxu3 %v397_v39  ;;  %v382_v59 = vld [vmem:[#allocation7 + $0x78] sm:$0xff]  ;;  %v375_v60 = vld [vmem:[#allocation7 + $0x40] sm:$0xff]  ;;  %v376_v61 = vld [vmem:[#allocation7 + $0x48] sm:$0xff] }
  0x6a   : > { %524 = vmatpush.msrb.mxu0 %v406_v37  ;;  %440 = vmatpush.msra.mxu1 %v391_v44  ;;  %v377_v62 = vld [vmem:[#allocation7 + $0x50] sm:$0xff]  ;;  %v378_v63 = vld [vmem:[#allocation7 + $0x58] sm:$0xff]  ;;  %v371_v0 = vld [vmem:[#allocation7 + $0x20] sm:$0xff] }
  0x6b   : > { %469 = vmatpush.msra.mxu2 %v392_v45  ;;  %498 = vmatpush.msra.mxu3 %v393_v46  ;;  %v372_v1 = vld [vmem:[#allocation7 + $0x28] sm:$0xff]  ;;  %v373_v2 = vld [vmem:[#allocation7 + $0x30] sm:$0xff]  ;;  %v374_v3 = vld [vmem:[#allocation7 + $0x38] sm:$0xff] }
  0x6c   : > { %525 = vmatpush.msrb.mxu0 %v402_v40  ;;  %441 = vmatpush.msra.mxu1 %v387_v48  ;;  %v367_v4 = vld [vmem:[#allocation7] sm:$0xff]  ;;  %v368_v5 = vld [vmem:[#allocation7 + $0x8] sm:$0xff]  ;;  %v369_v6 = vld [vmem:[#allocation7 + $0x10] sm:$0xff] }
  0x6d   : > { %897 = vmatmul.msk.f32.gmra.mxu0 %vm309_vm0, %v1441_v41  ;;  %470 = vmatpush.msra.mxu2 %v388_v49  ;;  %v370_v7 = vld [vmem:[#allocation7 + $0x18] sm:$0xff]  ;;  %v568_v8 = vld [vmem:[#allocation8 + $0x68] sm:$0xff]  ;;  %v569_v9 = vld [vmem:[#allocation8 + $0x70] sm:$0xff] }
  0x6e   : > { %526 = vmatpush.msrb.mxu0 %v398_v42  ;;  %499 = vmatpush.msra.mxu3 %v389_v50  ;;  %v567_v11 = vld [vmem:[#allocation8 + $0x60] sm:$0xff]  ;;  %v570_v12 = vld [vmem:[#allocation8 + $0x78] sm:$0xff]  ;;  %v564_v13 = vld [vmem:[#allocation8 + $0x48] sm:$0xff] }
  0x6f   : > { %442 = vmatpush.msra.mxu1 %v383_v52  ;;  %471 = vmatpush.msra.mxu2 %v384_v53  ;;  %v565_v14 = vld [vmem:[#allocation8 + $0x50] sm:$0xff]  ;;  %v563_v17 = vld [vmem:[#allocation8 + $0x40] sm:$0xff]  ;;  %v566_v18 = vld [vmem:[#allocation8 + $0x58] sm:$0xff] }
  0x70   : > { %527 = vmatpush.msrb.mxu0 %v394_v47  ;;  %500 = vmatpush.msra.mxu3 %v385_v54  ;;  %v560_v19 = vld [vmem:[#allocation8 + $0x28] sm:$0xff]  ;;  %v561_v20 = vld [vmem:[#allocation8 + $0x30] sm:$0xff]  ;;  %v559_v21 = vld [vmem:[#allocation8 + $0x20] sm:$0xff] }
  0x71   : > { %443 = vmatpush.msra.mxu1 %v379_v56  ;;  %472 = vmatpush.msra.mxu2 %v380_v57  ;;  %v562_v22 = vld [vmem:[#allocation8 + $0x38] sm:$0xff]  ;;  %v556_v24 = vld [vmem:[#allocation8 + $0x8] sm:$0xff]  ;;  %v557_v25 = vld [vmem:[#allocation8 + $0x10] sm:$0xff] }
  0x72   : > { %528 = vmatpush.msrb.mxu0 %v390_v51  ;;  %501 = vmatpush.msra.mxu3 %v381_v58  ;;  %v555_v26 = vld [vmem:[#allocation8] sm:$0xff]  ;;  %v558_v30 = vld [vmem:[#allocation8 + $0x18] sm:$0xff] }
  0x73   : > { %444 = vmatpush.msra.mxu1 %v375_v60  ;;  %473 = vmatpush.msra.mxu2 %v376_v61 }
  0x74   : > { %529 = vmatpush.msrb.mxu0 %v386_v55  ;;  %502 = vmatpush.msra.mxu3 %v377_v62 }
  0x75   : > { %898 = vmatmul.msk.f32.gmra.mxu0 %vm309_vm0, %v1446_v43  ;;  %445 = vmatpush.msra.mxu1 %v371_v0 }
  0x76   : > { %530 = vmatpush.msrb.mxu0 %v382_v59  ;;  %474 = vmatpush.msra.mxu2 %v372_v1 }
  0x77   : > { %503 = vmatpush.msra.mxu3 %v373_v2  ;;  %446 = vmatpush.msra.mxu1 %v367_v4 }
  0x78   : > { %531 = vmatpush.msrb.mxu0 %v378_v63  ;;  %475 = vmatpush.msra.mxu2 %v368_v5 }
  0x79   : > { %504 = vmatpush.msra.mxu3 %v369_v6  ;;  %595 = vmatpush.msrb.mxu1 %v567_v11  ;;  %v292_v6 = vld [vmem:[%s1416_s30 + $0x18] sm:$0xff] }
  0x7a   : > { %532 = vmatpush.msrb.mxu0 %v374_v3  ;;  %624 = vmatpush.msrb.mxu2 %v568_v8 }
  0x7b   : > { %653 = vmatpush.msrb.mxu3 %v569_v9  ;;  %596 = vmatpush.msrb.mxu1 %v563_v17  ;;  %v291_v17 = vld [vmem:[%s1416_s30 + $0x10] sm:$0xff] }
  0x7c   : > { %533 = vmatpush.msrb.mxu0 %v370_v7  ;;  %625 = vmatpush.msrb.mxu2 %v564_v13 }
  0x7d   : > { %654 = vmatpush.msrb.mxu3 %v565_v14  ;;  %597 = vmatpush.msrb.mxu1 %v559_v21 }
  0x7e   : > { %682 = vmatpush.msra.mxu0 %v570_v12  ;;  %626 = vmatpush.msrb.mxu2 %v560_v19 }
  0x7f   : > { %655 = vmatpush.msrb.mxu3 %v561_v20  ;;  %598 = vmatpush.msrb.mxu1 %v555_v26 }
  0x80   : > { %683 = vmatpush.msra.mxu0 %v566_v18  ;;  %627 = vmatpush.msrb.mxu2 %v556_v24  ;;  %v296_v18 = vld [vmem:[%s1416_s30 + $0x38] sm:$0xff] }
  0x81   : > { %656 = vmatpush.msrb.mxu3 %v557_v25 }
  0x82   : > { %684 = vmatpush.msra.mxu0 %v562_v22 }
  0x84   : > { %685 = vmatpush.msra.mxu0 %v558_v30  ;;  %v294_v30 = vld [vmem:[%s1416_s30 + $0x28] sm:$0xff] }
  0xda   : > { %v1450_v15 = vpop.f32.mrf.mxu0 }
  0xdb   : > { %v351_v16 = vmul.f32 0.5, %v1450_v15  ;;  %v547_v48 = vsub.f32 %v1450_v15, %v1431_v10  ;;  %v290_v15 = vld [vmem:[%s1416_s30 + $0x8] sm:$0xff] }
  0xdd   : > { %1010 = vtanh.f32 %v351_v16 }
  0xe2   : > { %v342_v23 = vpop.f32.mrf.mxu0 }
  0xe3   : > { %v1011_v28 = vpop.eup %1010  ;;  %v352_v29 = vmul.f32 0.5, %v342_v23  ;;  %v548_v50 = vsub.f32 %v342_v23, %v1436_v27 }
  0xe4   : > { %v359_v31 = vadd.f32 1.0, %v1011_v28 }
  0xe5   : > { %1012 = vtanh.f32 %v352_v29 }
  0xe6   : > { %v363_v32 = vmul.f32 0.5, %v359_v31 }
  0xe8   : > { %447 = vmatmul.f32.vlgmr.msra.gmra.mxu1 %v363_v32  ;;  %476 = vmatmul.f32.vlgmr.msra.gmra.mxu2 %v363_v32  ;;  %v551_v49 = vmul.f32 %v547_v48, %v363_v32  ;;  %v299_v48 = vld [vmem:[%s1416_s30 + $0x50] sm:$0xff] }
  0xe9   : > { %505 = vmatmul.f32.vlgmr.msra.gmra.mxu3 %v363_v32  ;;  %534 = vmatmul.f32.vlgmr.msrb.gmra.mxu0 %v363_v32  ;;  %v295_v32 = vld [vmem:[%s1416_s30 + $0x30] sm:$0xff] }
  0xea   : > { %v345_v33 = vpop.f32.mrf.mxu0 }
  0xeb   : > { %v1013_v34 = vpop.eup %1012  ;;  %v353_v35 = vmul.f32 0.5, %v345_v33  ;;  %v549_v52 = vsub.f32 %v345_v33, %v1441_v41 }
  0xec   : > { %v360_v36 = vadd.f32 1.0, %v1013_v34 }
  0xed   : > { %1014 = vtanh.f32 %v353_v35 }
  0xee   : > { %v364_v37 = vmul.f32 0.5, %v360_v36 }
  0xf0   : > { %450 = vmatmul.f32.gmra.mxu1 %v364_v37  ;;  %479 = vmatmul.f32.gmra.mxu2 %v364_v37  ;;  %v552_v51 = vmul.f32 %v548_v50, %v364_v37 }
  0xf1   : > { %508 = vmatmul.f32.gmra.mxu3 %v364_v37  ;;  %537 = vmatmul.f32.gmra.mxu0 %v364_v37 }
  0xf2   : > { %v348_v38 = vpop.f32.mrf.mxu0 }
  0xf3   : > { %v1015_v39 = vpop.eup %1014  ;;  %v354_v40 = vmul.f32 0.5, %v348_v38  ;;  %v550_v54 = vsub.f32 %v348_v38, %v1446_v43 }
  0xf4   : > { %v361_v42 = vadd.f32 1.0, %v1015_v39 }
  0xf5   : > { %1016 = vtanh.f32 %v354_v40 }
  0xf6   : > { %v365_v44 = vmul.f32 0.5, %v361_v42 }
  0xf8   : > { %453 = vmatmul.f32.gmra.mxu1 %v365_v44  ;;  %482 = vmatmul.f32.gmra.mxu2 %v365_v44  ;;  %v553_v53 = vmul.f32 %v549_v52, %v365_v44 }
  0xf9   : > { %511 = vmatmul.f32.gmra.mxu3 %v365_v44  ;;  %540 = vmatmul.f32.gmra.mxu0 %v365_v44 }
  0xfb   : > { %v1017_v45 = vpop.eup %1016 }
  0xfc   : > { %v362_v46 = vadd.f32 1.0, %v1017_v45 }
  0xfe   : > { %v366_v47 = vmul.f32 0.5, %v362_v46  ;;  %v298_v46 = vld [vmem:[%s1416_s30 + $0x48] sm:$0xff] }
 0x100   : > { %456 = vmatmul.f32.gmra.mxu1 %v366_v47  ;;  %485 = vmatmul.f32.gmra.mxu2 %v366_v47  ;;  %v554_v55 = vmul.f32 %v550_v54, %v366_v47 }
 0x101   : > { %514 = vmatmul.f32.gmra.mxu3 %v366_v47  ;;  %543 = vmatmul.f32.gmra.mxu0 %v366_v47 }
 0x108   : > { %899 = vmatmul.msk.f32.vlgmr.msrb.gmra.mxu1 %vm309_vm0, %v551_v49  ;;  %903 = vmatmul.msk.f32.vlgmr.msrb.gmra.mxu2 %vm309_vm0, %v551_v49 }
 0x109   : > { %907 = vmatmul.msk.f32.vlgmr.msrb.gmra.mxu3 %vm309_vm0, %v551_v49  ;;  %911 = vmatmul.msk.f32.vlgmr.msra.gmra.mxu0 %vm309_vm0, %v551_v49 }
 0x110   : > { %900 = vmatmul.msk.f32.gmra.mxu1 %vm309_vm0, %v552_v51  ;;  %904 = vmatmul.msk.f32.gmra.mxu2 %vm309_vm0, %v552_v51 }
 0x111   : > { %908 = vmatmul.msk.f32.gmra.mxu3 %vm309_vm0, %v552_v51  ;;  %912 = vmatmul.msk.f32.gmra.mxu0 %vm309_vm0, %v552_v51 }
 0x118   : > { %901 = vmatmul.msk.f32.gmra.mxu1 %vm309_vm0, %v553_v53  ;;  %905 = vmatmul.msk.f32.gmra.mxu2 %vm309_vm0, %v553_v53 }
 0x119   : > { %909 = vmatmul.msk.f32.gmra.mxu3 %vm309_vm0, %v553_v53  ;;  %913 = vmatmul.msk.f32.gmra.mxu0 %vm309_vm0, %v553_v53 }
 0x120   : > { %902 = vmatmul.msk.f32.gmra.mxu1 %vm309_vm0, %v554_v55  ;;  %906 = vmatmul.msk.f32.gmra.mxu2 %vm309_vm0, %v554_v55 }
 0x121   : > { %910 = vmatmul.msk.f32.gmra.mxu3 %vm309_vm0, %v554_v55  ;;  %914 = vmatmul.msk.f32.gmra.mxu0 %vm309_vm0, %v554_v55 }
 0x165   : > { %v448_v56 = vpop.f32.mrf.mxu1 }
 0x166   : > { %v535_v57 = vpop.f32.mrf.mxu0  ;;  %v699_v8 = vmul.f32 %v448_v56, %v1431_v10 }
 0x167   : > { %v702_v11 = vmul.f32 %v535_v57, %v292_v6 }
 0x16b   : > { %v477_v58 = vpop.f32.mrf.mxu2 }
 0x16c   : > { %v506_v59 = vpop.f32.mrf.mxu3  ;;  %v700_v10 = vmul.f32 %v477_v58, %v290_v15 }
 0x16d   : > { %v451_v60 = vpop.f32.mrf.mxu1  ;;  %v701_v19 = vmul.f32 %v506_v59, %v291_v17 }
 0x16e   : > { %v538_v61 = vpop.f32.mrf.mxu0  ;;  %v703_v21 = vmul.f32 %v451_v60, %v1436_v27  ;;  %v300_v27 = vld [vmem:[%s1416_s30 + $0x58] sm:$0xff]  ;;  %v302_v60 = vld [vmem:[%s1416_s30 + $0x68] sm:$0xff] }
 0x16f   : > { %v706_v24 = vmul.f32 %v538_v61, %v296_v18 }
 0x173   : > { %v480_v62 = vpop.f32.mrf.mxu2 }
 0x174   : > { %v509_v63 = vpop.f32.mrf.mxu3  ;;  %v704_v33 = vmul.f32 %v480_v62, %v294_v30  ;;  %v303_v62 = vld [vmem:[%s1416_s30 + $0x70] sm:$0xff] }
 0x175   : > { %v454_v0 = vpop.f32.mrf.mxu1  ;;  %v705_v34 = vmul.f32 %v509_v63, %v295_v32 }
 0x176   : > { %v541_v1 = vpop.f32.mrf.mxu0  ;;  %v707_v36 = vmul.f32 %v454_v0, %v1441_v41  ;;  %v304_v41 = vld [vmem:[%s1416_s30 + $0x78] sm:$0xff] }
 0x177   : > { %v710_v39 = vmul.f32 %v541_v1, %v300_v27 }
 0x17b   : > { %v483_v2 = vpop.f32.mrf.mxu2 }
 0x17c   : > { %v512_v3 = vpop.f32.mrf.mxu3  ;;  %v708_v49 = vmul.f32 %v483_v2, %v298_v46 }
 0x17d   : > { %v457_v4 = vpop.f32.mrf.mxu1  ;;  %v709_v50 = vmul.f32 %v512_v3, %v299_v48 }
 0x17e   : > { %v544_v5 = vpop.f32.mrf.mxu0  ;;  %v711_v52 = vmul.f32 %v457_v4, %v1446_v43 }
 0x17f   : > { %v714_v55 = vmul.f32 %v544_v5, %v304_v41 }
 0x183   : > { %v1475_v7 = vpop.f32.mrf.mxu2 }
 0x184   : > { %v1478_v9 = vpop.f32.mrf.mxu3  ;;  %v712_v63 = vmul.f32 %v1475_v7, %v302_v60 }
 0x185   : > { %v600_v12 = vpop.f32.mrf.mxu1  ;;  %v713_v43 = vmul.f32 %v1478_v9, %v303_v62 }
 0x186   : > { %v715_v13 = vadd.f32 %v699_v8, %v600_v12  ;;  %v687_v14 = vpop.f32.mrf.mxu0 }
 0x187   : > { %v718_v16 = vadd.f32 %v702_v11, %v687_v14 }
 0x188   : > { %731 = vst [vmem:[%s1484_s26] sm:$0xff] %v715_v13 }
 0x189   : > { %734 = vst [vmem:[%s1484_s26 + $0x18] sm:$0xff] %v718_v16 }
 0x18b   : > { %v629_v20 = vpop.f32.mrf.mxu2 }
 0x18c   : > { %v716_v22 = vadd.f32 %v700_v10, %v629_v20  ;;  %v658_v23 = vpop.f32.mrf.mxu3 }
 0x18d   : > { %v717_v25 = vadd.f32 %v701_v19, %v658_v23  ;;  %v603_v26 = vpop.f32.mrf.mxu1 }
 0x18e   : > { %732 = vst [vmem:[%s1484_s26 + $0x8] sm:$0xff] %v716_v22  ;;  %v719_v28 = vadd.f32 %v703_v21, %v603_v26  ;;  %v690_v29 = vpop.f32.mrf.mxu0 }
 0x18f   : > { %733 = vst [vmem:[%s1484_s26 + $0x10] sm:$0xff] %v717_v25  ;;  %v722_v31 = vadd.f32 %v706_v24, %v690_v29 }
 0x190   : > { %735 = vst [vmem:[%s1484_s26 + $0x20] sm:$0xff] %v719_v28 }
 0x191   : > { %738 = vst [vmem:[%s1484_s26 + $0x38] sm:$0xff] %v722_v31 }
 0x193   : > { %v632_v35 = vpop.f32.mrf.mxu2 }
 0x194   : > { %v720_v37 = vadd.f32 %v704_v33, %v632_v35  ;;  %v661_v38 = vpop.f32.mrf.mxu3 }
 0x195   : > { %v721_v40 = vadd.f32 %v705_v34, %v661_v38  ;;  %v606_v42 = vpop.f32.mrf.mxu1 }
 0x196   : > { %736 = vst [vmem:[%s1484_s26 + $0x28] sm:$0xff] %v720_v37  ;;  %v723_v44 = vadd.f32 %v707_v36, %v606_v42  ;;  %v693_v45 = vpop.f32.mrf.mxu0 }
 0x197   : > { %737 = vst [vmem:[%s1484_s26 + $0x30] sm:$0xff] %v721_v40  ;;  %v726_v47 = vadd.f32 %v710_v39, %v693_v45 }
 0x198   : > { %739 = vst [vmem:[%s1484_s26 + $0x40] sm:$0xff] %v723_v44 }
 0x199   : > { %742 = vst [vmem:[%s1484_s26 + $0x58] sm:$0xff] %v726_v47 }
 0x19b   : > { %v635_v51 = vpop.f32.mrf.mxu2 }
 0x19c   : > { %v724_v53 = vadd.f32 %v708_v49, %v635_v51  ;;  %v664_v54 = vpop.f32.mrf.mxu3 }
 0x19d   : > { %v725_v56 = vadd.f32 %v709_v50, %v664_v54  ;;  %v609_v57 = vpop.f32.mrf.mxu1 }
 0x19e   : > { %740 = vst [vmem:[%s1484_s26 + $0x48] sm:$0xff] %v724_v53  ;;  %v727_v58 = vadd.f32 %v711_v52, %v609_v57  ;;  %v696_v59 = vpop.f32.mrf.mxu0 }
 0x19f   : > { %741 = vst [vmem:[%s1484_s26 + $0x50] sm:$0xff] %v725_v56  ;;  %v730_v61 = vadd.f32 %v714_v55, %v696_v59 }
 0x1a0   : > { %743 = vst [vmem:[%s1484_s26 + $0x60] sm:$0xff] %v727_v58 }
 0x1a1   : > { %746 = vst [vmem:[%s1484_s26 + $0x78] sm:$0xff] %v730_v61 }
 0x1a3   : > { %v638_v0 = vpop.f32.mrf.mxu2  ;;  %754 = sbr.rel (!%p1324_p11) target bundleno = 455 (0x1c7), region = 56 }
 0x1a4   : > { %v728_v1 = vadd.f32 %v712_v63, %v638_v0  ;;  %v667_v2 = vpop.f32.mrf.mxu3 }
 0x1a5   : > { %v729_v3 = vadd.f32 %v713_v43, %v667_v2 }
 0x1a6   : > { %744 = vst [vmem:[%s1484_s26 + $0x68] sm:$0xff] %v728_v1 }
 0x1a7   : > { %745 = vst [vmem:[%s1484_s26 + $0x70] sm:$0xff] %v729_v3 }
 0x1a8   : > { %s1606_s1 = smov (!%p757_p6, %s756_s1), 4 }
 0x1a9   : > { %s929_s25 = sshll.u32 %s1606_s1, 5 }
 0x1aa   : > { %s761_s10 = ssub.s32 128, %s929_s25 }
 0x1ab   : > { %s762_s11 = sshll.u32 %s761_s10, 4 }
 0x1ac   : > { %763 = vsyncadd %s748_s29, %s762_s11  ;;  %p1525_p9 = scmp.ne.s32.totalorder %s929_s25, 0  ;;  %s931_s6 = sshll.u32 %s1293_s19, 7 }
 0x1ad   : > { %s767_s20 = scalar_lea.hbm %s1582_s4, %s931_s6  ;;  %s769_s9 = sshll.u32 %s1484_s26, 4  ;;  %s1534_s9 = int_to_ptr.vmem [resolvable:$true] %s769_s9 }
 0x1ae   : > { %s771_s8 = sshll.u32 %s767_s20, 4  ;;  %s923_s12 = sshll.u32 %s1606_s1, 9  ;;  %s1536_s8 = int_to_ptr.hbm [resolvable:$true] %s771_s8 }
 0x1af   : > { %s1147_s22 = sshra.s32 %s1534_s9, 4  ;;  %s1149_s23 = sshrl.u32 %s923_s12, 4  ;;  %s1148_s22 = int_to_ptr.vmem [resolvable:$true] %s1147_s22 }
 0x1b0   : > { %s1154_s30 = scalar_lea.vmem %s1148_s22, %s1149_s23  ;;  %s1244_s19 = smov [#allocation10]  }
 0x1b1   : > { %p1155_p11 = scmp.ne.s32.totalorder %s1148_s22, %s1154_s30  ;;  %s1158_s14 = scalar_lea.vmem %s1244_s19, 256 }
 0x1b2   : > { %p1160_p0 = scmp.lt.s32.totalorder %s1158_s14, %s1154_s30 }
 0x1b3   : > { %p1156_p10 = pnand %p1155_p11, %p1525_p9 }
 0x1b5   : > { %p1157_p1 = pneg %p1156_p10 }
 0x1b7   : > { %p1162_p2 = pnand %p1160_p0, %p1157_p1 }
 0x1b9   : > { %1165 = shalt.err (!%p1162_p2)
}
 0x1ba   : > { %s1166_s26 = sshra.s32 %s1536_s8, 4  ;;  %s1177_s6 = scalar_lea.hbm %s1582_s4, 320  ;;  %s1167_s26 = int_to_ptr.hbm [resolvable:$true] %s1166_s26 }
 0x1bb   : > { %s1173_s25 = scalar_lea.hbm %s1167_s26, %s1149_s23  ;;  %p1178_p4 = scmp.lt.s32.totalorder %s1167_s26, %s1582_s4 }
 0x1bc   : > { %p1174_p3 = scmp.ne.s32.totalorder %s1167_s26, %s1173_s25  ;;  %p1179_p12 = scmp.lt.s32.totalorder %s1177_s6, %s1173_s25 }
 0x1be   : > { %p1175_p7 = pnand %p1174_p3, %p1525_p9  ;;  %p1180_p13 = por %p1179_p12, %p1178_p4 }
 0x1c0   : > { %p1176_p8 = pneg %p1175_p7 }
 0x1c2   : > { %p1181_p5 = pnand %p1180_p13, %p1176_p8 }
 0x1c4   : > { %1184 = shalt.err (!%p1181_p5)
}
 0x1c5   : > { %s1245_s20 = smov 512   ;;  %s1246_s22 = smov 32  }
 0x1c6   : > { %777 = dma.vmem_to_hbm [thread:$0]  (%p1525_p9), %s1534_s9, %s923_s12, %s1536_s8, %s748_s29, %s1245_s20, %s1245_s20, %s1246_s22  }
 0x1c7 PF: > { %p966_p6 = scmp.ge.s32.totalorder %s1232_s18, 2  ;;  %s786_s23 = sand.u32 1, %s1220_s15  }
 0x1c8   : > { %p1598_p11 = scmp.ne.s32.totalorder %s1588_s28, 0  ;;  %s787_s30 = scalar_lea.sflag [#allocation4], %s786_s23 }
 0x1ca   : > { %p957_p10 = pnand %p966_p6, %p1598_p11 }
 0x1cc   : > { %p958_p1 = pneg %p957_p10 }
 0x1ce   : > { %1215 = dma.done.wait (%p958_p1), %s787_s30, 2048  }
 0x1cf   : > { %1217 = vsyncadd (%p958_p1), %s787_s30, 4294965248  ;;  %p19_p0 = scmp.ge.s32.totalorder %s1297_s21, 5   ;;  %s1599_s15 = smov %s1224_s16 }
 0x1d0   : > { %s1600_s16 = smov %s1228_s17  ;;  %s1601_s17 = smov %s1309_s24 }
 0x1d1   : > { %s1602_s18 = smov %s1297_s21  ;;  %21 = sbr.rel (!%p19_p0) target bundleno = 9 (0x9), region = 93 }
 0x1d6   :  { %793 = vsyncpa [#allocation3], 1 }
 0x1d7   :  { %795 = vsyncpa [#allocation3 + $0x1], 1 }
 0x1d8   :  { %796 = vsyncpa [#allocation6], 1 }
 0x1d9   :  { %797 = vsyncpa [#allocation9], 1 }
 0x1da   :  { %798 = vsyncpa [#allocation4], 1 }
 0x1db   :  { %800 = vsyncpa [#allocation4 + $0x1], 1 }

</bundles_post_ra>
